<compile_context>
chip_gen: v7x
topology: tpu7x:2x2x1
jax: 0.10.0
libtpu: 0.0.40
codegen_flags: <defaults>
</compile_context>

<pallas_src>
import jax
import jax.numpy as jnp
from jax.experimental import pallas as pl
from jax.experimental.pallas import tpu as pltpu

# ---- problem constants (from the module) ----
CIN, COUT = 12, 9
KH = KW = 5
STRIDE, PAD = 1, 1
CIN_PAD = 16     # 12 -> 16 (sublane-aligned contraction)
COUT_PAD = 16    # 9 -> 16  (sublane-aligned output channels; do NOT pad further)


def _round_up(a, b):
    return ((a + b - 1) // b) * b


def _make_kernel(Wp, Fout):
    """Kernel closure over the static flat-shift offsets."""

    def conv_tanh_kernel(w_ref, x_ref, b_ref, o_ref):
        # w_ref: (KH*KW, COUT_PAD, CIN_PAD) bf16  -- VMEM-resident (constant map)
        # x_ref: (1, CIN_PAD, Fin)          bf16  -- one image's flat padded canvas
        # b_ref: (COUT_PAD, 1)              f32   -- VMEM-resident
        # o_ref: (1, COUT_PAD, Fout)        f32   -- lane-dense output canvas
        acc = jnp.zeros((COUT_PAD, Fout), jnp.float32)
        for kh in range(KH):
            for kw in range(KW):
                off = kh * Wp + kw                      # static flat shift
                xs = x_ref[0, :, off:off + Fout]        # (CIN_PAD, Fout) shifted view
                wk = w_ref[kh * KW + kw]                # (COUT_PAD, CIN_PAD)
                acc = acc + jnp.dot(wk, xs, preferred_element_type=jnp.float32)
        o_ref[0] = jnp.tanh(acc + b_ref[...])

    return conv_tanh_kernel


def conv2d_tanh(x_nchw, weight, bias):
    """x_nchw: (N, CIN, H, W) f32; weight: (COUT, CIN, KH, KW); bias: (COUT,)."""
    N, C, H, W = x_nchw.shape
    assert C == CIN
    Hp, Wp = H + 2 * PAD, W + 2 * PAD
    Ho = (H + 2 * PAD - KH) // STRIDE + 1
    Wo = (W + 2 * PAD - KW) // STRIDE + 1

    # Flat canvases (per image): output position q = ho*Wp + wo reads input flat
    # position q + kh*Wp + kw for tap (kh, kw); only columns wo < Wo are valid.
    max_off = (KH - 1) * Wp + (KW - 1)
    Fout = _round_up(Ho * Wp, 128)                       # lane-dense output canvas
    Fin = _round_up(max(Hp * Wp, Fout + max_off), 128)   # input canvas + shift room

    # ---- glue: bf16 first, then pad/flatten (one cheap pass over the input) ----
    xp = jnp.pad(x_nchw.astype(jnp.bfloat16),
                 ((0, 0), (0, CIN_PAD - CIN), (PAD, PAD), (PAD, PAD)))
    x_flat = xp.reshape(N, CIN_PAD, Hp * Wp)
    x_flat = jnp.pad(x_flat, ((0, 0), (0, 0), (0, Fin - Hp * Wp)))

    # weights: (COUT,CIN,KH,KW) -> (KH*KW, COUT_PAD, CIN_PAD) bf16 (tiny, resident)
    w_r = jnp.transpose(weight, (2, 3, 0, 1)).reshape(KH * KW, COUT, CIN)
    w_pad = jnp.pad(w_r, ((0, 0), (0, COUT_PAD - COUT),
                          (0, CIN_PAD - CIN))).astype(jnp.bfloat16)
    b_pad = jnp.pad(bias, (0, COUT_PAD - COUT)).reshape(COUT_PAD, 1).astype(jnp.float32)

    # VMEM budget: double-buffered per-image in/out blocks + resident weights/bias.
    work = 2 * (CIN_PAD * Fin * 2 + COUT_PAD * Fout * 4) \
        + KH * KW * COUT_PAD * CIN_PAD * 2 + COUT_PAD * 4
    vmem_limit = int(min(max(2 * work, 16 * 2**20), 60 * 2**20))

    out_flat = pl.pallas_call(
        _make_kernel(Wp, Fout),
        out_shape=jax.ShapeDtypeStruct((N, COUT_PAD, Fout), jnp.float32),
        grid_spec=pltpu.PrefetchScalarGridSpec(
            num_scalar_prefetch=0,
            grid=(N,),
            in_specs=[
                pl.BlockSpec((KH * KW, COUT_PAD, CIN_PAD), lambda n: (0, 0, 0)),
                pl.BlockSpec((1, CIN_PAD, Fin), lambda n: (n, 0, 0)),
                pl.BlockSpec((COUT_PAD, 1), lambda n: (0, 0)),
            ],
            out_specs=pl.BlockSpec((1, COUT_PAD, Fout), lambda n: (n, 0, 0)),
        ),
        compiler_params=pltpu.CompilerParams(
            dimension_semantics=("parallel",),
            vmem_limit_bytes=vmem_limit),
    )(w_pad, x_flat, b_pad)

    # carve the valid (Ho, Wo) window out of each (Ho, Wp) output canvas
    out = out_flat[:, :COUT, :Ho * Wp].reshape(N, COUT, Ho, Wp)[..., :Wo]
    return out


if __name__ == "__main__":
    key = jax.random.PRNGKey(0)
    kx, kw_, kb = jax.random.split(key, 3)

    # small shapes consistent with Conv2d(12, 9, 5, 1, padding=1)
    N, H, W = 2, 16, 16
    x = jax.random.normal(kx, (N, CIN, H, W), dtype=jnp.float32)

    # deterministic PyTorch-style init: U(-1/sqrt(fan_in), 1/sqrt(fan_in))
    fan_in = CIN * KH * KW
    bound = 1.0 / (fan_in ** 0.5)
    weight = jax.random.uniform(kw_, (COUT, CIN, KH, KW), jnp.float32, -bound, bound)
    bias = jax.random.uniform(kb, (COUT,), jnp.float32, -bound, bound)

    fn = jax.jit(conv2d_tanh)
    y = jax.block_until_ready(fn(x, weight, bias))

    # reference check with XLA conv (f32)
    ref = jax.lax.conv_general_dilated(
        x, weight, window_strides=(STRIDE, STRIDE),
        padding=((PAD, PAD), (PAD, PAD)),
        dimension_numbers=("NCHW", "OIHW", "NCHW"))
    ref = jnp.tanh(ref + bias[None, :, None, None])

    Ho = H + 2 * PAD - KH + 1
    Wo = W + 2 * PAD - KW + 1
    assert y.shape == (N, COUT, Ho, Wo), y.shape
    # bf16-streamed taps with f32 accumulation vs f32 reference
    assert jnp.allclose(y, ref, atol=3e-2, rtol=0.0)
    print("KERNEL_OK")
</pallas_src>

<mosaic_0001>
module attributes {stable_mosaic.version = 11 : i64} {
  func.func @conv_tanh_kernel(%arg0: i32, %arg1: memref<25x16x16xbf16, #tpu.memory_space<vmem>>, %arg2: memref<1x16x384xbf16, #tpu.memory_space<vmem>>, %arg3: memref<16x1xf32, #tpu.memory_space<vmem>>, %arg4: memref<1x16x256xf32, #tpu.memory_space<vmem>>) attributes {dimension_semantics = [#tpu.dimension_semantics<parallel>], iteration_bounds = array<i64: 2>, scalar_prefetch = 0 : i64, scratch_operands = 0 : i64, tpu.core_type = #tpu.core_type<tc>, window_params = [{pipeline_mode = #tpu.pipeline_mode<synchronous>, transform_indices = @transform_0, window_bounds = array<i64: 25, 16, 16>}, {transform_indices = @transform_1, window_bounds = array<i64: 1, 16, 384>}, {pipeline_mode = #tpu.pipeline_mode<synchronous>, transform_indices = @transform_2, window_bounds = array<i64: 16, 1>}, {transform_indices = @transform_3, window_bounds = array<i64: 1, 16, 256>}]} {
    %cst = arith.constant 0.000000e+00 : f32
    %0 = vector.broadcast %cst : f32 to vector<16x256xf32>
    %c0 = arith.constant 0 : index
    %c0_0 = arith.constant 0 : index
    %c0_1 = arith.constant 0 : index
    %1 = vector.load %arg2[%c0, %c0_0, %c0_1] : memref<1x16x384xbf16, #tpu.memory_space<vmem>>, vector<1x16x256xbf16>
    %2 = vector.shape_cast %1 : vector<1x16x256xbf16> to vector<16x256xbf16>
    %c0_2 = arith.constant 0 : index
    %c0_3 = arith.constant 0 : index
    %c0_4 = arith.constant 0 : index
    %3 = vector.load %arg1[%c0_2, %c0_3, %c0_4] : memref<25x16x16xbf16, #tpu.memory_space<vmem>>, vector<1x16x16xbf16>
    %4 = vector.shape_cast %3 : vector<1x16x16xbf16> to vector<16x16xbf16>
    %cst_5 = arith.constant dense<0.000000e+00> : vector<16x256xf32>
    %5 = tpu.matmul %4, %2, %cst_5 {dimension_numbers = #tpu.dot_dimension_numbers<[1], [0], [0], [1], [0, 0, 1, 1], [], []>} : vector<16x16xbf16>, vector<16x256xbf16>, vector<16x256xf32> -> vector<16x256xf32>
    %6 = arith.addf %0, %5 : vector<16x256xf32>
    %c0_6 = arith.constant 0 : index
    %c0_7 = arith.constant 0 : index
    %c1 = arith.constant 1 : index
    %7 = vector.load %arg2[%c0_6, %c0_7, %c1] : memref<1x16x384xbf16, #tpu.memory_space<vmem>>, vector<1x16x256xbf16>
    %8 = vector.shape_cast %7 : vector<1x16x256xbf16> to vector<16x256xbf16>
    %c1_8 = arith.constant 1 : index
    %c0_9 = arith.constant 0 : index
    %c0_10 = arith.constant 0 : index
    %9 = vector.load %arg1[%c1_8, %c0_9, %c0_10] : memref<25x16x16xbf16, #tpu.memory_space<vmem>>, vector<1x16x16xbf16>
    %10 = vector.shape_cast %9 : vector<1x16x16xbf16> to vector<16x16xbf16>
    %cst_11 = arith.constant dense<0.000000e+00> : vector<16x256xf32>
    %11 = tpu.matmul %10, %8, %cst_11 {dimension_numbers = #tpu.dot_dimension_numbers<[1], [0], [0], [1], [0, 0, 1, 1], [], []>} : vector<16x16xbf16>, vector<16x256xbf16>, vector<16x256xf32> -> vector<16x256xf32>
    %12 = arith.addf %6, %11 : vector<16x256xf32>
    %c0_12 = arith.constant 0 : index
    %c0_13 = arith.constant 0 : index
    %c2 = arith.constant 2 : index
    %13 = vector.load %arg2[%c0_12, %c0_13, %c2] : memref<1x16x384xbf16, #tpu.memory_space<vmem>>, vector<1x16x256xbf16>
    %14 = vector.shape_cast %13 : vector<1x16x256xbf16> to vector<16x256xbf16>
    %c2_14 = arith.constant 2 : index
    %c0_15 = arith.constant 0 : index
    %c0_16 = arith.constant 0 : index
    %15 = vector.load %arg1[%c2_14, %c0_15, %c0_16] : memref<25x16x16xbf16, #tpu.memory_space<vmem>>, vector<1x16x16xbf16>
    %16 = vector.shape_cast %15 : vector<1x16x16xbf16> to vector<16x16xbf16>
    %cst_17 = arith.constant dense<0.000000e+00> : vector<16x256xf32>
    %17 = tpu.matmul %16, %14, %cst_17 {dimension_numbers = #tpu.dot_dimension_numbers<[1], [0], [0], [1], [0, 0, 1, 1], [], []>} : vector<16x16xbf16>, vector<16x256xbf16>, vector<16x256xf32> -> vector<16x256xf32>
    %18 = arith.addf %12, %17 : vector<16x256xf32>
    %c0_18 = arith.constant 0 : index
    %c0_19 = arith.constant 0 : index
    %c3 = arith.constant 3 : index
    %19 = vector.load %arg2[%c0_18, %c0_19, %c3] : memref<1x16x384xbf16, #tpu.memory_space<vmem>>, vector<1x16x256xbf16>
    %20 = vector.shape_cast %19 : vector<1x16x256xbf16> to vector<16x256xbf16>
    %c3_20 = arith.constant 3 : index
    %c0_21 = arith.constant 0 : index
    %c0_22 = arith.constant 0 : index
    %21 = vector.load %arg1[%c3_20, %c0_21, %c0_22] : memref<25x16x16xbf16, #tpu.memory_space<vmem>>, vector<1x16x16xbf16>
    %22 = vector.shape_cast %21 : vector<1x16x16xbf16> to vector<16x16xbf16>
    %cst_23 = arith.constant dense<0.000000e+00> : vector<16x256xf32>
    %23 = tpu.matmul %22, %20, %cst_23 {dimension_numbers = #tpu.dot_dimension_numbers<[1], [0], [0], [1], [0, 0, 1, 1], [], []>} : vector<16x16xbf16>, vector<16x256xbf16>, vector<16x256xf32> -> vector<16x256xf32>
    %24 = arith.addf %18, %23 : vector<16x256xf32>
    %c0_24 = arith.constant 0 : index
    %c0_25 = arith.constant 0 : index
    %c4 = arith.constant 4 : index
    %25 = vector.load %arg2[%c0_24, %c0_25, %c4] : memref<1x16x384xbf16, #tpu.memory_space<vmem>>, vector<1x16x256xbf16>
    %26 = vector.shape_cast %25 : vector<1x16x256xbf16> to vector<16x256xbf16>
    %c4_26 = arith.constant 4 : index
    %c0_27 = arith.constant 0 : index
    %c0_28 = arith.constant 0 : index
    %27 = vector.load %arg1[%c4_26, %c0_27, %c0_28] : memref<25x16x16xbf16, #tpu.memory_space<vmem>>, vector<1x16x16xbf16>
    %28 = vector.shape_cast %27 : vector<1x16x16xbf16> to vector<16x16xbf16>
    %cst_29 = arith.constant dense<0.000000e+00> : vector<16x256xf32>
    %29 = tpu.matmul %28, %26, %cst_29 {dimension_numbers = #tpu.dot_dimension_numbers<[1], [0], [0], [1], [0, 0, 1, 1], [], []>} : vector<16x16xbf16>, vector<16x256xbf16>, vector<16x256xf32> -> vector<16x256xf32>
    %30 = arith.addf %24, %29 : vector<16x256xf32>
    %c0_30 = arith.constant 0 : index
    %c0_31 = arith.constant 0 : index
    %c18 = arith.constant 18 : index
    %31 = vector.load %arg2[%c0_30, %c0_31, %c18] : memref<1x16x384xbf16, #tpu.memory_space<vmem>>, vector<1x16x256xbf16>
    %32 = vector.shape_cast %31 : vector<1x16x256xbf16> to vector<16x256xbf16>
    %c5 = arith.constant 5 : index
    %c0_32 = arith.constant 0 : index
    %c0_33 = arith.constant 0 : index
    %33 = vector.load %arg1[%c5, %c0_32, %c0_33] : memref<25x16x16xbf16, #tpu.memory_space<vmem>>, vector<1x16x16xbf16>
    %34 = vector.shape_cast %33 : vector<1x16x16xbf16> to vector<16x16xbf16>
    %cst_34 = arith.constant dense<0.000000e+00> : vector<16x256xf32>
    %35 = tpu.matmul %34, %32, %cst_34 {dimension_numbers = #tpu.dot_dimension_numbers<[1], [0], [0], [1], [0, 0, 1, 1], [], []>} : vector<16x16xbf16>, vector<16x256xbf16>, vector<16x256xf32> -> vector<16x256xf32>
    %36 = arith.addf %30, %35 : vector<16x256xf32>
    %c0_35 = arith.constant 0 : index
    %c0_36 = arith.constant 0 : index
    %c19 = arith.constant 19 : index
    %37 = vector.load %arg2[%c0_35, %c0_36, %c19] : memref<1x16x384xbf16, #tpu.memory_space<vmem>>, vector<1x16x256xbf16>
    %38 = vector.shape_cast %37 : vector<1x16x256xbf16> to vector<16x256xbf16>
    %c6 = arith.constant 6 : index
    %c0_37 = arith.constant 0 : index
    %c0_38 = arith.constant 0 : index
    %39 = vector.load %arg1[%c6, %c0_37, %c0_38] : memref<25x16x16xbf16, #tpu.memory_space<vmem>>, vector<1x16x16xbf16>
    %40 = vector.shape_cast %39 : vector<1x16x16xbf16> to vector<16x16xbf16>
    %cst_39 = arith.constant dense<0.000000e+00> : vector<16x256xf32>
    %41 = tpu.matmul %40, %38, %cst_39 {dimension_numbers = #tpu.dot_dimension_numbers<[1], [0], [0], [1], [0, 0, 1, 1], [], []>} : vector<16x16xbf16>, vector<16x256xbf16>, vector<16x256xf32> -> vector<16x256xf32>
    %42 = arith.addf %36, %41 : vector<16x256xf32>
    %c0_40 = arith.constant 0 : index
    %c0_41 = arith.constant 0 : index
    %c20 = arith.constant 20 : index
    %43 = vector.load %arg2[%c0_40, %c0_41, %c20] : memref<1x16x384xbf16, #tpu.memory_space<vmem>>, vector<1x16x256xbf16>
    %44 = vector.shape_cast %43 : vector<1x16x256xbf16> to vector<16x256xbf16>
    %c7 = arith.constant 7 : index
    %c0_42 = arith.constant 0 : index
    %c0_43 = arith.constant 0 : index
    %45 = vector.load %arg1[%c7, %c0_42, %c0_43] : memref<25x16x16xbf16, #tpu.memory_space<vmem>>, vector<1x16x16xbf16>
    %46 = vector.shape_cast %45 : vector<1x16x16xbf16> to vector<16x16xbf16>
    %cst_44 = arith.constant dense<0.000000e+00> : vector<16x256xf32>
    %47 = tpu.matmul %46, %44, %cst_44 {dimension_numbers = #tpu.dot_dimension_numbers<[1], [0], [0], [1], [0, 0, 1, 1], [], []>} : vector<16x16xbf16>, vector<16x256xbf16>, vector<16x256xf32> -> vector<16x256xf32>
    %48 = arith.addf %42, %47 : vector<16x256xf32>
    %c0_45 = arith.constant 0 : index
    %c0_46 = arith.constant 0 : index
    %c21 = arith.constant 21 : index
    %49 = vector.load %arg2[%c0_45, %c0_46, %c21] : memref<1x16x384xbf16, #tpu.memory_space<vmem>>, vector<1x16x256xbf16>
    %50 = vector.shape_cast %49 : vector<1x16x256xbf16> to vector<16x256xbf16>
    %c8 = arith.constant 8 : index
    %c0_47 = arith.constant 0 : index
    %c0_48 = arith.constant 0 : index
    %51 = vector.load %arg1[%c8, %c0_47, %c0_48] : memref<25x16x16xbf16, #tpu.memory_space<vmem>>, vector<1x16x16xbf16>
    %52 = vector.shape_cast %51 : vector<1x16x16xbf16> to vector<16x16xbf16>
    %cst_49 = arith.constant dense<0.000000e+00> : vector<16x256xf32>
    %53 = tpu.matmul %52, %50, %cst_49 {dimension_numbers = #tpu.dot_dimension_numbers<[1], [0], [0], [1], [0, 0, 1, 1], [], []>} : vector<16x16xbf16>, vector<16x256xbf16>, vector<16x256xf32> -> vector<16x256xf32>
    %54 = arith.addf %48, %53 : vector<16x256xf32>
    %c0_50 = arith.constant 0 : index
    %c0_51 = arith.constant 0 : index
    %c22 = arith.constant 22 : index
    %55 = vector.load %arg2[%c0_50, %c0_51, %c22] : memref<1x16x384xbf16, #tpu.memory_space<vmem>>, vector<1x16x256xbf16>
    %56 = vector.shape_cast %55 : vector<1x16x256xbf16> to vector<16x256xbf16>
    %c9 = arith.constant 9 : index
    %c0_52 = arith.constant 0 : index
    %c0_53 = arith.constant 0 : index
    %57 = vector.load %arg1[%c9, %c0_52, %c0_53] : memref<25x16x16xbf16, #tpu.memory_space<vmem>>, vector<1x16x16xbf16>
    %58 = vector.shape_cast %57 : vector<1x16x16xbf16> to vector<16x16xbf16>
    %cst_54 = arith.constant dense<0.000000e+00> : vector<16x256xf32>
    %59 = tpu.matmul %58, %56, %cst_54 {dimension_numbers = #tpu.dot_dimension_numbers<[1], [0], [0], [1], [0, 0, 1, 1], [], []>} : vector<16x16xbf16>, vector<16x256xbf16>, vector<16x256xf32> -> vector<16x256xf32>
    %60 = arith.addf %54, %59 : vector<16x256xf32>
    %c0_55 = arith.constant 0 : index
    %c0_56 = arith.constant 0 : index
    %c36 = arith.constant 36 : index
    %61 = vector.load %arg2[%c0_55, %c0_56, %c36] : memref<1x16x384xbf16, #tpu.memory_space<vmem>>, vector<1x16x256xbf16>
    %62 = vector.shape_cast %61 : vector<1x16x256xbf16> to vector<16x256xbf16>
    %c10 = arith.constant 10 : index
    %c0_57 = arith.constant 0 : index
    %c0_58 = arith.constant 0 : index
    %63 = vector.load %arg1[%c10, %c0_57, %c0_58] : memref<25x16x16xbf16, #tpu.memory_space<vmem>>, vector<1x16x16xbf16>
    %64 = vector.shape_cast %63 : vector<1x16x16xbf16> to vector<16x16xbf16>
    %cst_59 = arith.constant dense<0.000000e+00> : vector<16x256xf32>
    %65 = tpu.matmul %64, %62, %cst_59 {dimension_numbers = #tpu.dot_dimension_numbers<[1], [0], [0], [1], [0, 0, 1, 1], [], []>} : vector<16x16xbf16>, vector<16x256xbf16>, vector<16x256xf32> -> vector<16x256xf32>
    %66 = arith.addf %60, %65 : vector<16x256xf32>
    %c0_60 = arith.constant 0 : index
    %c0_61 = arith.constant 0 : index
    %c37 = arith.constant 37 : index
    %67 = vector.load %arg2[%c0_60, %c0_61, %c37] : memref<1x16x384xbf16, #tpu.memory_space<vmem>>, vector<1x16x256xbf16>
    %68 = vector.shape_cast %67 : vector<1x16x256xbf16> to vector<16x256xbf16>
    %c11 = arith.constant 11 : index
    %c0_62 = arith.constant 0 : index
    %c0_63 = arith.constant 0 : index
    %69 = vector.load %arg1[%c11, %c0_62, %c0_63] : memref<25x16x16xbf16, #tpu.memory_space<vmem>>, vector<1x16x16xbf16>
    %70 = vector.shape_cast %69 : vector<1x16x16xbf16> to vector<16x16xbf16>
    %cst_64 = arith.constant dense<0.000000e+00> : vector<16x256xf32>
    %71 = tpu.matmul %70, %68, %cst_64 {dimension_numbers = #tpu.dot_dimension_numbers<[1], [0], [0], [1], [0, 0, 1, 1], [], []>} : vector<16x16xbf16>, vector<16x256xbf16>, vector<16x256xf32> -> vector<16x256xf32>
    %72 = arith.addf %66, %71 : vector<16x256xf32>
    %c0_65 = arith.constant 0 : index
    %c0_66 = arith.constant 0 : index
    %c38 = arith.constant 38 : index
    %73 = vector.load %arg2[%c0_65, %c0_66, %c38] : memref<1x16x384xbf16, #tpu.memory_space<vmem>>, vector<1x16x256xbf16>
    %74 = vector.shape_cast %73 : vector<1x16x256xbf16> to vector<16x256xbf16>
    %c12 = arith.constant 12 : index
    %c0_67 = arith.constant 0 : index
    %c0_68 = arith.constant 0 : index
    %75 = vector.load %arg1[%c12, %c0_67, %c0_68] : memref<25x16x16xbf16, #tpu.memory_space<vmem>>, vector<1x16x16xbf16>
    %76 = vector.shape_cast %75 : vector<1x16x16xbf16> to vector<16x16xbf16>
    %cst_69 = arith.constant dense<0.000000e+00> : vector<16x256xf32>
    %77 = tpu.matmul %76, %74, %cst_69 {dimension_numbers = #tpu.dot_dimension_numbers<[1], [0], [0], [1], [0, 0, 1, 1], [], []>} : vector<16x16xbf16>, vector<16x256xbf16>, vector<16x256xf32> -> vector<16x256xf32>
    %78 = arith.addf %72, %77 : vector<16x256xf32>
    %c0_70 = arith.constant 0 : index
    %c0_71 = arith.constant 0 : index
    %c39 = arith.constant 39 : index
    %79 = vector.load %arg2[%c0_70, %c0_71, %c39] : memref<1x16x384xbf16, #tpu.memory_space<vmem>>, vector<1x16x256xbf16>
    %80 = vector.shape_cast %79 : vector<1x16x256xbf16> to vector<16x256xbf16>
    %c13 = arith.constant 13 : index
    %c0_72 = arith.constant 0 : index
    %c0_73 = arith.constant 0 : index
    %81 = vector.load %arg1[%c13, %c0_72, %c0_73] : memref<25x16x16xbf16, #tpu.memory_space<vmem>>, vector<1x16x16xbf16>
    %82 = vector.shape_cast %81 : vector<1x16x16xbf16> to vector<16x16xbf16>
    %cst_74 = arith.constant dense<0.000000e+00> : vector<16x256xf32>
    %83 = tpu.matmul %82, %80, %cst_74 {dimension_numbers = #tpu.dot_dimension_numbers<[1], [0], [0], [1], [0, 0, 1, 1], [], []>} : vector<16x16xbf16>, vector<16x256xbf16>, vector<16x256xf32> -> vector<16x256xf32>
    %84 = arith.addf %78, %83 : vector<16x256xf32>
    %c0_75 = arith.constant 0 : index
    %c0_76 = arith.constant 0 : index
    %c40 = arith.constant 40 : index
    %85 = vector.load %arg2[%c0_75, %c0_76, %c40] : memref<1x16x384xbf16, #tpu.memory_space<vmem>>, vector<1x16x256xbf16>
    %86 = vector.shape_cast %85 : vector<1x16x256xbf16> to vector<16x256xbf16>
    %c14 = arith.constant 14 : index
    %c0_77 = arith.constant 0 : index
    %c0_78 = arith.constant 0 : index
    %87 = vector.load %arg1[%c14, %c0_77, %c0_78] : memref<25x16x16xbf16, #tpu.memory_space<vmem>>, vector<1x16x16xbf16>
    %88 = vector.shape_cast %87 : vector<1x16x16xbf16> to vector<16x16xbf16>
    %cst_79 = arith.constant dense<0.000000e+00> : vector<16x256xf32>
    %89 = tpu.matmul %88, %86, %cst_79 {dimension_numbers = #tpu.dot_dimension_numbers<[1], [0], [0], [1], [0, 0, 1, 1], [], []>} : vector<16x16xbf16>, vector<16x256xbf16>, vector<16x256xf32> -> vector<16x256xf32>
    %90 = arith.addf %84, %89 : vector<16x256xf32>
    %c0_80 = arith.constant 0 : index
    %c0_81 = arith.constant 0 : index
    %c54 = arith.constant 54 : index
    %91 = vector.load %arg2[%c0_80, %c0_81, %c54] : memref<1x16x384xbf16, #tpu.memory_space<vmem>>, vector<1x16x256xbf16>
    %92 = vector.shape_cast %91 : vector<1x16x256xbf16> to vector<16x256xbf16>
    %c15 = arith.constant 15 : index
    %c0_82 = arith.constant 0 : index
    %c0_83 = arith.constant 0 : index
    %93 = vector.load %arg1[%c15, %c0_82, %c0_83] : memref<25x16x16xbf16, #tpu.memory_space<vmem>>, vector<1x16x16xbf16>
    %94 = vector.shape_cast %93 : vector<1x16x16xbf16> to vector<16x16xbf16>
    %cst_84 = arith.constant dense<0.000000e+00> : vector<16x256xf32>
    %95 = tpu.matmul %94, %92, %cst_84 {dimension_numbers = #tpu.dot_dimension_numbers<[1], [0], [0], [1], [0, 0, 1, 1], [], []>} : vector<16x16xbf16>, vector<16x256xbf16>, vector<16x256xf32> -> vector<16x256xf32>
    %96 = arith.addf %90, %95 : vector<16x256xf32>
    %c0_85 = arith.constant 0 : index
    %c0_86 = arith.constant 0 : index
    %c55 = arith.constant 55 : index
    %97 = vector.load %arg2[%c0_85, %c0_86, %c55] : memref<1x16x384xbf16, #tpu.memory_space<vmem>>, vector<1x16x256xbf16>
    %98 = vector.shape_cast %97 : vector<1x16x256xbf16> to vector<16x256xbf16>
    %c16 = arith.constant 16 : index
    %c0_87 = arith.constant 0 : index
    %c0_88 = arith.constant 0 : index
    %99 = vector.load %arg1[%c16, %c0_87, %c0_88] : memref<25x16x16xbf16, #tpu.memory_space<vmem>>, vector<1x16x16xbf16>
    %100 = vector.shape_cast %99 : vector<1x16x16xbf16> to vector<16x16xbf16>
    %cst_89 = arith.constant dense<0.000000e+00> : vector<16x256xf32>
    %101 = tpu.matmul %100, %98, %cst_89 {dimension_numbers = #tpu.dot_dimension_numbers<[1], [0], [0], [1], [0, 0, 1, 1], [], []>} : vector<16x16xbf16>, vector<16x256xbf16>, vector<16x256xf32> -> vector<16x256xf32>
    %102 = arith.addf %96, %101 : vector<16x256xf32>
    %c0_90 = arith.constant 0 : index
    %c0_91 = arith.constant 0 : index
    %c56 = arith.constant 56 : index
    %103 = vector.load %arg2[%c0_90, %c0_91, %c56] : memref<1x16x384xbf16, #tpu.memory_space<vmem>>, vector<1x16x256xbf16>
    %104 = vector.shape_cast %103 : vector<1x16x256xbf16> to vector<16x256xbf16>
    %c17 = arith.constant 17 : index
    %c0_92 = arith.constant 0 : index
    %c0_93 = arith.constant 0 : index
    %105 = vector.load %arg1[%c17, %c0_92, %c0_93] : memref<25x16x16xbf16, #tpu.memory_space<vmem>>, vector<1x16x16xbf16>
    %106 = vector.shape_cast %105 : vector<1x16x16xbf16> to vector<16x16xbf16>
    %cst_94 = arith.constant dense<0.000000e+00> : vector<16x256xf32>
    %107 = tpu.matmul %106, %104, %cst_94 {dimension_numbers = #tpu.dot_dimension_numbers<[1], [0], [0], [1], [0, 0, 1, 1], [], []>} : vector<16x16xbf16>, vector<16x256xbf16>, vector<16x256xf32> -> vector<16x256xf32>
    %108 = arith.addf %102, %107 : vector<16x256xf32>
    %c0_95 = arith.constant 0 : index
    %c0_96 = arith.constant 0 : index
    %c57 = arith.constant 57 : index
    %109 = vector.load %arg2[%c0_95, %c0_96, %c57] : memref<1x16x384xbf16, #tpu.memory_space<vmem>>, vector<1x16x256xbf16>
    %110 = vector.shape_cast %109 : vector<1x16x256xbf16> to vector<16x256xbf16>
    %c18_97 = arith.constant 18 : index
    %c0_98 = arith.constant 0 : index
    %c0_99 = arith.constant 0 : index
    %111 = vector.load %arg1[%c18_97, %c0_98, %c0_99] : memref<25x16x16xbf16, #tpu.memory_space<vmem>>, vector<1x16x16xbf16>
    %112 = vector.shape_cast %111 : vector<1x16x16xbf16> to vector<16x16xbf16>
    %cst_100 = arith.constant dense<0.000000e+00> : vector<16x256xf32>
    %113 = tpu.matmul %112, %110, %cst_100 {dimension_numbers = #tpu.dot_dimension_numbers<[1], [0], [0], [1], [0, 0, 1, 1], [], []>} : vector<16x16xbf16>, vector<16x256xbf16>, vector<16x256xf32> -> vector<16x256xf32>
    %114 = arith.addf %108, %113 : vector<16x256xf32>
    %c0_101 = arith.constant 0 : index
    %c0_102 = arith.constant 0 : index
    %c58 = arith.constant 58 : index
    %115 = vector.load %arg2[%c0_101, %c0_102, %c58] : memref<1x16x384xbf16, #tpu.memory_space<vmem>>, vector<1x16x256xbf16>
    %116 = vector.shape_cast %115 : vector<1x16x256xbf16> to vector<16x256xbf16>
    %c19_103 = arith.constant 19 : index
    %c0_104 = arith.constant 0 : index
    %c0_105 = arith.constant 0 : index
    %117 = vector.load %arg1[%c19_103, %c0_104, %c0_105] : memref<25x16x16xbf16, #tpu.memory_space<vmem>>, vector<1x16x16xbf16>
    %118 = vector.shape_cast %117 : vector<1x16x16xbf16> to vector<16x16xbf16>
    %cst_106 = arith.constant dense<0.000000e+00> : vector<16x256xf32>
    %119 = tpu.matmul %118, %116, %cst_106 {dimension_numbers = #tpu.dot_dimension_numbers<[1], [0], [0], [1], [0, 0, 1, 1], [], []>} : vector<16x16xbf16>, vector<16x256xbf16>, vector<16x256xf32> -> vector<16x256xf32>
    %120 = arith.addf %114, %119 : vector<16x256xf32>
    %c0_107 = arith.constant 0 : index
    %c0_108 = arith.constant 0 : index
    %c72 = arith.constant 72 : index
    %121 = vector.load %arg2[%c0_107, %c0_108, %c72] : memref<1x16x384xbf16, #tpu.memory_space<vmem>>, vector<1x16x256xbf16>
    %122 = vector.shape_cast %121 : vector<1x16x256xbf16> to vector<16x256xbf16>
    %c20_109 = arith.constant 20 : index
    %c0_110 = arith.constant 0 : index
    %c0_111 = arith.constant 0 : index
    %123 = vector.load %arg1[%c20_109, %c0_110, %c0_111] : memref<25x16x16xbf16, #tpu.memory_space<vmem>>, vector<1x16x16xbf16>
    %124 = vector.shape_cast %123 : vector<1x16x16xbf16> to vector<16x16xbf16>
    %cst_112 = arith.constant dense<0.000000e+00> : vector<16x256xf32>
    %125 = tpu.matmul %124, %122, %cst_112 {dimension_numbers = #tpu.dot_dimension_numbers<[1], [0], [0], [1], [0, 0, 1, 1], [], []>} : vector<16x16xbf16>, vector<16x256xbf16>, vector<16x256xf32> -> vector<16x256xf32>
    %126 = arith.addf %120, %125 : vector<16x256xf32>
    %c0_113 = arith.constant 0 : index
    %c0_114 = arith.constant 0 : index
    %c73 = arith.constant 73 : index
    %127 = vector.load %arg2[%c0_113, %c0_114, %c73] : memref<1x16x384xbf16, #tpu.memory_space<vmem>>, vector<1x16x256xbf16>
    %128 = vector.shape_cast %127 : vector<1x16x256xbf16> to vector<16x256xbf16>
    %c21_115 = arith.constant 21 : index
    %c0_116 = arith.constant 0 : index
    %c0_117 = arith.constant 0 : index
    %129 = vector.load %arg1[%c21_115, %c0_116, %c0_117] : memref<25x16x16xbf16, #tpu.memory_space<vmem>>, vector<1x16x16xbf16>
    %130 = vector.shape_cast %129 : vector<1x16x16xbf16> to vector<16x16xbf16>
    %cst_118 = arith.constant dense<0.000000e+00> : vector<16x256xf32>
    %131 = tpu.matmul %130, %128, %cst_118 {dimension_numbers = #tpu.dot_dimension_numbers<[1], [0], [0], [1], [0, 0, 1, 1], [], []>} : vector<16x16xbf16>, vector<16x256xbf16>, vector<16x256xf32> -> vector<16x256xf32>
    %132 = arith.addf %126, %131 : vector<16x256xf32>
    %c0_119 = arith.constant 0 : index
    %c0_120 = arith.constant 0 : index
    %c74 = arith.constant 74 : index
    %133 = vector.load %arg2[%c0_119, %c0_120, %c74] : memref<1x16x384xbf16, #tpu.memory_space<vmem>>, vector<1x16x256xbf16>
    %134 = vector.shape_cast %133 : vector<1x16x256xbf16> to vector<16x256xbf16>
    %c22_121 = arith.constant 22 : index
    %c0_122 = arith.constant 0 : index
    %c0_123 = arith.constant 0 : index
    %135 = vector.load %arg1[%c22_121, %c0_122, %c0_123] : memref<25x16x16xbf16, #tpu.memory_space<vmem>>, vector<1x16x16xbf16>
    %136 = vector.shape_cast %135 : vector<1x16x16xbf16> to vector<16x16xbf16>
    %cst_124 = arith.constant dense<0.000000e+00> : vector<16x256xf32>
    %137 = tpu.matmul %136, %134, %cst_124 {dimension_numbers = #tpu.dot_dimension_numbers<[1], [0], [0], [1], [0, 0, 1, 1], [], []>} : vector<16x16xbf16>, vector<16x256xbf16>, vector<16x256xf32> -> vector<16x256xf32>
    %138 = arith.addf %132, %137 : vector<16x256xf32>
    %c0_125 = arith.constant 0 : index
    %c0_126 = arith.constant 0 : index
    %c75 = arith.constant 75 : index
    %139 = vector.load %arg2[%c0_125, %c0_126, %c75] : memref<1x16x384xbf16, #tpu.memory_space<vmem>>, vector<1x16x256xbf16>
    %140 = vector.shape_cast %139 : vector<1x16x256xbf16> to vector<16x256xbf16>
    %c23 = arith.constant 23 : index
    %c0_127 = arith.constant 0 : index
    %c0_128 = arith.constant 0 : index
    %141 = vector.load %arg1[%c23, %c0_127, %c0_128] : memref<25x16x16xbf16, #tpu.memory_space<vmem>>, vector<1x16x16xbf16>
    %142 = vector.shape_cast %141 : vector<1x16x16xbf16> to vector<16x16xbf16>
    %cst_129 = arith.constant dense<0.000000e+00> : vector<16x256xf32>
    %143 = tpu.matmul %142, %140, %cst_129 {dimension_numbers = #tpu.dot_dimension_numbers<[1], [0], [0], [1], [0, 0, 1, 1], [], []>} : vector<16x16xbf16>, vector<16x256xbf16>, vector<16x256xf32> -> vector<16x256xf32>
    %144 = arith.addf %138, %143 : vector<16x256xf32>
    %c0_130 = arith.constant 0 : index
    %c0_131 = arith.constant 0 : index
    %c76 = arith.constant 76 : index
    %145 = vector.load %arg2[%c0_130, %c0_131, %c76] : memref<1x16x384xbf16, #tpu.memory_space<vmem>>, vector<1x16x256xbf16>
    %146 = vector.shape_cast %145 : vector<1x16x256xbf16> to vector<16x256xbf16>
    %c24 = arith.constant 24 : index
    %c0_132 = arith.constant 0 : index
    %c0_133 = arith.constant 0 : index
    %147 = vector.load %arg1[%c24, %c0_132, %c0_133] : memref<25x16x16xbf16, #tpu.memory_space<vmem>>, vector<1x16x16xbf16>
    %148 = vector.shape_cast %147 : vector<1x16x16xbf16> to vector<16x16xbf16>
    %cst_134 = arith.constant dense<0.000000e+00> : vector<16x256xf32>
    %149 = tpu.matmul %148, %146, %cst_134 {dimension_numbers = #tpu.dot_dimension_numbers<[1], [0], [0], [1], [0, 0, 1, 1], [], []>} : vector<16x16xbf16>, vector<16x256xbf16>, vector<16x256xf32> -> vector<16x256xf32>
    %150 = arith.addf %144, %149 : vector<16x256xf32>
    %c0_135 = arith.constant 0 : index
    %c0_136 = arith.constant 0 : index
    %151 = vector.load %arg3[%c0_135, %c0_136] : memref<16x1xf32, #tpu.memory_space<vmem>>, vector<16x1xf32>
    %152 = vector.broadcast %151 : vector<16x1xf32> to vector<16x256xf32>
    %153 = arith.addf %150, %152 : vector<16x256xf32>
    %154 = math.tanh %153 : vector<16x256xf32>
    %c0_137 = arith.constant 0 : index
    %c0_138 = arith.constant 0 : index
    %c0_139 = arith.constant 0 : index
    %155 = vector.load %arg4[%c0_137, %c0_138, %c0_139] : memref<1x16x256xf32, #tpu.memory_space<vmem>>, vector<1x16x256xf32>
    %156 = vector.shape_cast %155 : vector<1x16x256xf32> to vector<16x256xf32>
    %157 = vector.shape_cast %154 : vector<16x256xf32> to vector<1x16x256xf32>
    tpu.vector_store %arg4[%c0_137, %c0_138, %c0_139], %157 {strides = array<i32>} : memref<1x16x256xf32, #tpu.memory_space<vmem>>, vector<1x16x256xf32>,
    return
  }
  func.func @transform_0(%arg0: i32) -> (i32, i32, i32) {
    %c0_i32 = arith.constant 0 : i32
    %c0_i32_0 = arith.constant 0 : i32
    %c0_i32_1 = arith.constant 0 : i32
    %c0_i32_2 = arith.constant 0 : i32
    return %c0_i32, %c0_i32_0, %c0_i32_1 : i32, i32, i32
  }
  func.func @transform_1(%arg0: i32) -> (i32, i32, i32) {
    %c0_i32 = arith.constant 0 : i32
    %c0_i32_0 = arith.constant 0 : i32
    %c0_i32_1 = arith.constant 0 : i32
    return %arg0, %c0_i32, %c0_i32_0 : i32, i32, i32
  }
  func.func @transform_2(%arg0: i32) -> (i32, i32) {
    %c0_i32 = arith.constant 0 : i32
    %c0_i32_0 = arith.constant 0 : i32
    %c0_i32_1 = arith.constant 0 : i32
    return %c0_i32, %c0_i32_0 : i32, i32
  }
  func.func @transform_3(%arg0: i32) -> (i32, i32, i32) {
    %c0_i32 = arith.constant 0 : i32
    %c0_i32_0 = arith.constant 0 : i32
    %c0_i32_1 = arith.constant 0 : i32
    return %arg0, %c0_i32, %c0_i32_0 : i32, i32, i32
  }
}

</mosaic_0001>

<bundles_post_ra>
// kernel: conv2d_tanh.1
= control target key start
LH: loop header
LB: loop body
LE: loop exit
PB: predicated region body
PF: predicated region fallthrough
CT: control target
= control target key end

     0   :  { %s2322_s12 = smov 0   ;;  %s2580_s0 = inlined_call_operand.vmem [shape: bf16[25,16,16], index: 0, kind: input, shape index: {}]   ;;  %s2581_s1 = inlined_call_operand.vmem [shape: bf16[2,16,384], index: 1, kind: input, shape index: {}]   ;;  %s2582_s2 = inlined_call_operand.vmem [shape: f32[16,1], index: 2, kind: input, shape index: {}]   ;;  %s2583_s3 = inlined_call_operand.vmem [shape: f32[2,16,256], index: 3, kind: output, shape index: {}]  }
   0x1 LB: > { %s1986_s13 = sadd.s32 4294967295, %s2275_s12   ;;  %p1990_p0 = scmp.ge.s32.totalorder %s2275_s12, 1  ;;  %s2275_s12 = sphi %s2322_s12, %s13_s12  }
   0x2   : > { %p137_p1 = scmp.lt.s32.totalorder %s2275_s12, 3 }
   0x4   : > { %p138_p2 = pnand %p1990_p0, %p137_p1 }
   0x5   : > { %p161_p3 = scmp.lt.s32.totalorder (!%p138_p2), %s1986_s13, 1  ;;  %v2277_v0 = vmov (!%p138_p2), 0   ;;  %s2278_s18 = smov (!%p138_p2), 90   ;;  %vm1024_vm0 = vcmask (!%p138_p2), 736256   ;;  %vm207_vm1 = vcmask (!%p138_p2), 1039360   ;;  %v2236_v10 = vld [vmem:[%s2580_s0 + $0x60] sm:$0xff] (!%p138_p2)  }
   0x6   : > { %141 = sbr.rel (%p138_p2) target bundleno = 518 (0x206), region = 32  ;;  %1064 = vmatprep.mubr.bf16.mxu0 (!%p138_p2), %v2277_v0  ;;  %248 = vmatprep.mubr.bf16.mxu1 (!%p138_p2), %v2277_v0  ;;  %s2279_s19 = smov (!%p138_p2), 127   ;;  %vm212_vm2 = vcmask (!%p138_p2), 130048   ;;  %vm1093_vm3 = vcmask (!%p138_p2), 728064   ;;  %v2237_v18 = vld [vmem:[%s2580_s0 + $0x8] sm:$0xff] (!%p138_p2)   ;;  %vm1162_vm4 = vcmask (!%p138_p2), 719872  }
   0x7   : > { %2230 = vset.pattern.permute.xlu0 (!%p138_p2), %v2277_v0  ;;  %2231 = vset.pattern.permute.xlu1 (!%p138_p2), %v2277_v0  ;;  %s2280_s20 = smov (!%p138_p2), 89   ;;  %s2281_s21 = smov (!%p138_p2), 88   ;;  %v2238_v22 = vld [vmem:[%s2580_s0 + $0x68] sm:$0xff] (!%p138_p2)   ;;  %vm334_vm5 = vcmask (!%p138_p2), 1031168   ;;  %v2239_v29 = vld [vmem:[%s2580_s0] sm:$0xff] (!%p138_p2)   ;;  %vm1231_vm6 = vcmask (!%p138_p2), 605184  }
   0x8   : > { %s2282_s22 = smov (!%p138_p2), 126   ;;  %s2283_s23 = smov (!%p138_p2), 74   ;;  %v1907_v31 = vld [vmem:[%s2582_s2] sm:$0xff] (!%p138_p2)  ;;  %v1908_v34 = vld [vmem:[%s2582_s2 + $0x8] sm:$0xff] (!%p138_p2)  ;;  %v2240_v36 = vld [vmem:[%s2580_s0 + $0x70] sm:$0xff] (!%p138_p2)   ;;  %vm403_vm7 = vcmask (!%p138_p2), 1022976  }
   0x9   : > { %s2284_s24 = smov (!%p138_p2), 125   ;;  %s2285_s25 = smov (!%p138_p2), 73   ;;  %v2241_v43 = vld [vmem:[%s2580_s0 + $0x10] sm:$0xff] (!%p138_p2)   ;;  %vm1300_vm8 = vcmask (!%p138_p2), 596992   ;;  %v2242_v48 = vld [vmem:[%s2580_s0 + $0x78] sm:$0xff] (!%p138_p2)   ;;  %vm472_vm9 = vcmask (!%p138_p2), 1014784  }
   0xa   : > { %s2286_s26 = smov (!%p138_p2), 124   ;;  %s2287_s27 = smov (!%p138_p2), 72   ;;  %v2243_v55 = vld [vmem:[%s2580_s0 + $0x18] sm:$0xff] (!%p138_p2)   ;;  %vm1369_vm10 = vcmask (!%p138_p2), 588800   ;;  %v2244_v60 = vld [vmem:[%s2580_s0 + $0x80] sm:$0xff] (!%p138_p2)   ;;  %vm541_vm11 = vcmask (!%p138_p2), 900096  }
   0xb   : > { %s2288_s28 = smov (!%p138_p2), 110   ;;  %s2289_s29 = smov (!%p138_p2), 71   ;;  %vm1438_vm12 = vcmask (!%p138_p2), 580608   ;;  %vm610_vm13 = vcmask (!%p138_p2), 891904   ;;  %vm1507_vm14 = vcmask (!%p138_p2), 572416   ;;  %vm679_vm15 = vcmask (!%p138_p2), 883712  }
   0xc   : > { %s2290_s30 = smov (!%p138_p2), 109   ;;  %s2291_s4 = smov (!%p138_p2), 70  }
   0xd   : > { %s2585_s13 = smov (!%p161_p3, %s1986_s13), 1  ;;  %s2292_s5 = smov 108  }
   0xe   : > { %s2196_s14 = smul.u32 24, %s2585_s13  ;;  %s2293_s6 = smov 56  }
   0xf   : > { %s2294_s7 = smov 107   ;;  %s2295_s8 = smov 55  }
  0x10   : > { %s165_s17 = scalar_lea.vmem %s2581_s1, %s2196_s14  ;;  %s2296_s9 = smov 106  }
  0x11   : > { %v2340_v1 = vld [vmem:[%s165_s17 + $0x4] ss:$12 sps:$4 sm:$0xff]   ;;  %v2342_v2 = vld [vmem:[%s165_s17] ss:$12 sps:$4 sm:$0xff]   ;;  %v2345_v3 = vld [vmem:[%s165_s17 + $0x8] ss:$12 sps:$4 sm:$0xff]  }
  0x12   : > { %1020 = vrot.lane.b32.xlu0 %v2340_v1, %s2278_s18  ;;  %1018 = vrot.lane.b32.xlu1 %v2342_v2, %s2278_s18  ;;  %s2297_s10 = smov 54   ;;  %s2298_s11 = smov 92  }
  0x13   : > { %s2299_s16 = smov 53  }
  0x16   : > { %1022 = vrot.lane.b32.xlu0 %v2345_v3, %s2278_s18  ;;  %203 = vrot.lane.b32.xlu1 %v2340_v1, %s2279_s19 }
  0x1a   : > { %205 = vrot.lane.b32.xlu0 %v2345_v3, %s2279_s19  ;;  %1089 = vrot.lane.b32.xlu1 %v2340_v1, %s2280_s20 }
  0x1e   : > { %1091 = vrot.lane.b32.xlu0 %v2345_v3, %s2280_s20  ;;  %201 = vrot.lane.b32.xlu1 %v2342_v2, %s2279_s19  ;;  %s2300_s19 = smov 91  }
  0x22   : > { %1087 = vrot.lane.b32.xlu0 %v2342_v2, %s2280_s20  ;;  %1158 = vrot.lane.b32.xlu1 %v2340_v1, %s2281_s21 }
  0x26   : > { %1160 = vrot.lane.b32.xlu0 %v2345_v3, %s2281_s21  ;;  %1156 = vrot.lane.b32.xlu1 %v2342_v2, %s2281_s21  ;;  %s2099_s21 = sshll.u32 %s2585_s13, 5 }
  0x2a   : > { %330 = vrot.lane.b32.xlu0 %v2340_v1, %s2282_s22  ;;  %332 = vrot.lane.b32.xlu1 %v2345_v3, %s2282_s22 }
  0x2e   : > { %1227 = vrot.lane.b32.xlu0 %v2340_v1, %s2283_s23  ;;  %1229 = vrot.lane.b32.xlu1 %v2345_v3, %s2283_s23 }
  0x32   : > { %328 = vrot.lane.b32.xlu0 %v2342_v2, %s2282_s22  ;;  %1225 = vrot.lane.b32.xlu1 %v2342_v2, %s2283_s23  ;;  %s2301_s22 = smov 52  }
  0x36   : > { %399 = vrot.lane.b32.xlu0 %v2340_v1, %s2284_s24  ;;  %401 = vrot.lane.b32.xlu1 %v2345_v3, %s2284_s24 }
  0x3a   : > { %1296 = vrot.lane.b32.xlu0 %v2340_v1, %s2285_s25  ;;  %1298 = vrot.lane.b32.xlu1 %v2345_v3, %s2285_s25 }
  0x3e   : > { %397 = vrot.lane.b32.xlu0 %v2342_v2, %s2284_s24  ;;  %1294 = vrot.lane.b32.xlu1 %v2342_v2, %s2285_s25  ;;  %s170_s24 = scalar_lea.vmem %s2583_s3, %s2099_s21 }
  0x42   : > { %468 = vrot.lane.b32.xlu0 %v2340_v1, %s2286_s26  ;;  %470 = vrot.lane.b32.xlu1 %v2345_v3, %s2286_s26 }
  0x46   : > { %1365 = vrot.lane.b32.xlu0 %v2340_v1, %s2287_s27  ;;  %1367 = vrot.lane.b32.xlu1 %v2345_v3, %s2287_s27 }
  0x4a   : > { %466 = vrot.lane.b32.xlu0 %v2342_v2, %s2286_s26  ;;  %1363 = vrot.lane.b32.xlu1 %v2342_v2, %s2287_s27 }
  0x4e   : > { %537 = vrot.lane.b32.xlu0 %v2340_v1, %s2288_s28  ;;  %539 = vrot.lane.b32.xlu1 %v2345_v3, %s2288_s28 }
  0x52   : > { %1434 = vrot.lane.b32.xlu0 %v2340_v1, %s2289_s29  ;;  %1436 = vrot.lane.b32.xlu1 %v2345_v3, %s2289_s29 }
  0x56   : > { %535 = vrot.lane.b32.xlu0 %v2342_v2, %s2288_s28  ;;  %1432 = vrot.lane.b32.xlu1 %v2342_v2, %s2289_s29 }
  0x5a   : > { %606 = vrot.lane.b32.xlu0 %v2340_v1, %s2290_s30  ;;  %608 = vrot.lane.b32.xlu1 %v2345_v3, %s2290_s30 }
  0x5e   : > { %1503 = vrot.lane.b32.xlu0 %v2340_v1, %s2291_s4  ;;  %1505 = vrot.lane.b32.xlu1 %v2345_v3, %s2291_s4 }
  0x62   : > { %604 = vrot.lane.b32.xlu0 %v2342_v2, %s2290_s30  ;;  %1501 = vrot.lane.b32.xlu1 %v2342_v2, %s2291_s4 }
  0x66   : > { %675 = vrot.lane.b32.xlu0 %v2340_v1, %s2292_s5  ;;  %677 = vrot.lane.b32.xlu1 %v2345_v3, %s2292_s5 }
  0x6a   : > { %1572 = vrot.lane.b32.xlu0 %v2340_v1, %s2293_s6  ;;  %1574 = vrot.lane.b32.xlu1 %v2345_v3, %s2293_s6 }
  0x6e   : > { %673 = vrot.lane.b32.xlu0 %v2342_v2, %s2292_s5  ;;  %1570 = vrot.lane.b32.xlu1 %v2342_v2, %s2293_s6 }
  0x72   : > { %744 = vrot.lane.b32.xlu0 %v2340_v1, %s2294_s7  ;;  %746 = vrot.lane.b32.xlu1 %v2345_v3, %s2294_s7 }
  0x76   : > { %1641 = vrot.lane.b32.xlu0 %v2340_v1, %s2295_s8  ;;  %1643 = vrot.lane.b32.xlu1 %v2345_v3, %s2295_s8 }
  0x7a   : > { %742 = vrot.lane.b32.xlu0 %v2342_v2, %s2294_s7  ;;  %1639 = vrot.lane.b32.xlu1 %v2342_v2, %s2295_s8 }
  0x7e   : > { %813 = vrot.lane.b32.xlu0 %v2340_v1, %s2296_s9  ;;  %815 = vrot.lane.b32.xlu1 %v2345_v3, %s2296_s9 }
  0x82   : > { %1710 = vrot.lane.b32.xlu0 %v2340_v1, %s2297_s10  ;;  %1712 = vrot.lane.b32.xlu1 %v2345_v3, %s2297_s10 }
  0x84   : > { %v1021_v4 = vpop.permute.xlu0 %1020  ;;  %v1019_v5 = vpop.permute.xlu1 %1018 }
  0x85   : > { %v1025_v9 = vsel %vm1024_vm0, %v1019_v5, %v1021_v4 }
  0x86   : > { %811 = vrot.lane.b32.xlu0 %v2342_v2, %s2296_s9  ;;  %1708 = vrot.lane.b32.xlu1 %v2342_v2, %s2297_s10 }
  0x88   : > { %v1023_v6 = vpop.permute.xlu0 %1022  ;;  %v204_v7 = vpop.permute.xlu1 %203 }
  0x89   : > { %v1026_v8 = vsel %vm1024_vm0, %v1021_v4, %v1023_v6  ;;  %v2245_v4 = vld [vmem:[%s2580_s0 + $0x20] sm:$0xff]   ;;  %vm1576_vm0 = vcmask 457728  }
  0x8a   : > { %1032 = vmatprep.subr.bf16.mxu0 %v1026_v8  ;;  %882 = vrot.lane.b32.xlu0 %v2340_v1, %s2298_s11 }
  0x8b   : > { %1033 = vmatpush1.bf16.msra.mxu0 %v1025_v9  ;;  %884 = vrot.lane.b32.xlu1 %v2345_v3, %s2298_s11  ;;  %v2246_v9 = vld [vmem:[%s2580_s0 + $0x88] sm:$0xff]  }
  0x8c   : > { %v206_v11 = vpop.permute.xlu0 %205  ;;  %v1090_v12 = vpop.permute.xlu1 %1089 }
  0x8d   : > { %v209_v13 = vsel %vm207_vm1, %v204_v7, %v206_v11 }
  0x8e   : > { %1779 = vrot.lane.b32.xlu0 %v2340_v1, %s2299_s16  ;;  %216 = vmatprep.subr.bf16.mxu1 %v209_v13 }
  0x8f   : > { %2048 = vmatmul.mubr.msk.bf16.vlgmr.msra.gmra.mrb[0].mxu0 %vm212_vm2, %v2236_v10  ;;  %1781 = vrot.lane.b32.xlu1 %v2345_v3, %s2299_s16 }
  0x90   : > { %v1092_v14 = vpop.permute.xlu0 %1091  ;;  %1133 = vmatprep.mubr.bf16.mxu0 %v2277_v0  ;;  %v202_v15 = vpop.permute.xlu1 %201 }
  0x91   : > { %v1095_v16 = vsel %vm1093_vm3, %v1090_v12, %v1092_v14  ;;  %v208_v17 = vsel %vm207_vm1, %v202_v15, %v204_v7  ;;  %vm748_vm1 = vcmask 875520  }
  0x92   : > { %880 = vrot.lane.b32.xlu0 %v2342_v2, %s2298_s11  ;;  %1101 = vmatprep.subr.bf16.mxu0 %v1095_v16  ;;  %v2247_v16 = vld [vmem:[%s2580_s0 + $0x28] sm:$0xff]  }
  0x93   : > { %217 = vmatpush1.bf16.msra.mxu1 %v208_v17  ;;  %1777 = vrot.lane.b32.xlu1 %v2342_v2, %s2299_s16 }
  0x94   : > { %v1088_v19 = vpop.permute.xlu0 %1087  ;;  %277 = vmatprep.subr.bf16.mxu1 %v2340_v1  ;;  %v1159_v21 = vpop.permute.xlu1 %1158 }
  0x95   : > { %v1094_v20 = vsel %vm1093_vm3, %v1088_v19, %v1090_v12  ;;  %vm1645_vm3 = vcmask 449536  }
  0x96   : > { %2000 = vmatmul.mubr.msk.bf16.vlgmr.msra.gmra.mrb[0].mxu1 %vm212_vm2, %v2237_v18  ;;  %951 = vrot.lane.b32.xlu0 %v2340_v1, %s2300_s19 }
  0x97   : > { %1102 = vmatpush1.bf16.msra.mxu0 %v1094_v20  ;;  %953 = vrot.lane.b32.xlu1 %v2345_v3, %s2300_s19 }
  0x98   : > { %v1161_v23 = vpop.permute.xlu0 %1160  ;;  %278 = vmatpush1.bf16.msra.mxu1 %v2342_v2  ;;  %309 = vmatprep.mubr.bf16.mxu1 %v2277_v0  ;;  %v1157_v24 = vpop.permute.xlu1 %1156 }
  0x99   : > { %v1164_v25 = vsel %vm1162_vm4, %v1159_v21, %v1161_v23  ;;  %v1163_v26 = vsel %vm1162_vm4, %v1157_v24, %v1159_v21  ;;  %v2248_v21 = vld [vmem:[%s2580_s0 + $0x90] sm:$0xff]   ;;  %vm817_vm4 = vcmask 867328  }
  0x9a   : > { %1848 = vrot.lane.b32.xlu0 %v2340_v1, %s2301_s22  ;;  %1170 = vmatprep.subr.bf16.mxu0 %v1164_v25 }
  0x9b   : > { %2052 = vmatmul.mubr.msk.bf16.vlgmr.msra.gmra.mrb[0].mxu0 %vm212_vm2, %v2238_v22  ;;  %1850 = vrot.lane.b32.xlu1 %v2345_v3, %s2301_s22 }
  0x9c   : > { %v331_v27 = vpop.permute.xlu0 %330  ;;  %1171 = vmatpush1.bf16.msra.mxu0 %v1163_v26  ;;  %1202 = vmatprep.mubr.bf16.mxu0 %v2277_v0  ;;  %v333_v28 = vpop.permute.xlu1 %332 }
  0x9d   : > { %v336_v30 = vsel %vm334_vm5, %v331_v27, %v333_v28  ;;  %v2249_v28 = vld [vmem:[%s2580_s0 + $0x30] sm:$0xff]  }
  0x9e   : > { %949 = vrot.lane.b32.xlu0 %v2342_v2, %s2300_s19  ;;  %342 = vmatprep.subr.bf16.mxu1 %v336_v30 }
  0x9f   : > { %1846 = vrot.lane.b32.xlu1 %v2342_v2, %s2301_s22 }
  0xa0   : > { %v1228_v32 = vpop.permute.xlu0 %1227  ;;  %v1230_v33 = vpop.permute.xlu1 %1229 }
  0xa1   : > { %v1233_v35 = vsel %vm1231_vm6, %v1228_v32, %v1230_v33  ;;  %v2250_v33 = vld [vmem:[%s2580_s0 + $0x98] sm:$0xff]  }
  0xa2   : > { %2004 = vmatmul.mubr.msk.bf16.vlgmr.msra.gmra.mrb[0].mxu1 %vm212_vm2, %v2239_v29  ;;  %1911 = vperm.xlu0 %2230, %v1907_v31  }
  0xa3   : > { %1239 = vmatprep.subr.bf16.mxu0 %v1233_v35  ;;  %374 = vmatprep.mubr.bf16.mxu1 %v2277_v0 }
  0xa4   : > { %v329_v37 = vpop.permute.xlu0 %328  ;;  %1916 = vperm.xlu1 %2231, %v1908_v34   ;;  %v1226_v39 = vpop.permute.xlu1 %1225 }
  0xa5   : > { %v335_v38 = vsel %vm334_vm5, %v329_v37, %v331_v27  ;;  %v1232_v40 = vsel %vm1231_vm6, %v1226_v39, %v1228_v32  ;;  %vm1714_vm5 = vcmask 441344   ;;  %vm886_vm6 = vcmask 752640  }
  0xa6   : > { %343 = vmatpush1.bf16.msra.mxu1 %v335_v38 }
  0xa7   : > { %2056 = vmatmul.mubr.msk.bf16.vlgmr.msra.gmra.mrb[0].mxu0 %vm212_vm2, %v2240_v36 }
  0xa8   : > { %v400_v41 = vpop.permute.xlu0 %399  ;;  %1240 = vmatpush1.bf16.msra.mxu0 %v1232_v40  ;;  %1271 = vmatprep.mubr.bf16.mxu0 %v2277_v0  ;;  %v402_v42 = vpop.permute.xlu1 %401  ;;  %v2251_v40 = vld [vmem:[%s2580_s0 + $0x38] sm:$0xff]  }
  0xa9   : > { %v405_v44 = vsel %vm403_vm7, %v400_v41, %v402_v42 }
  0xaa   : > { %411 = vmatprep.subr.bf16.mxu1 %v405_v44 }
  0xac   : > { %v1297_v45 = vpop.permute.xlu0 %1296  ;;  %v1299_v46 = vpop.permute.xlu1 %1298 }
  0xad   : > { %v1302_v47 = vsel %vm1300_vm8, %v1297_v45, %v1299_v46 }
  0xae   : > { %2008 = vmatmul.mubr.msk.bf16.vlgmr.msra.gmra.mrb[0].mxu1 %vm212_vm2, %v2241_v43  ;;  %1308 = vmatprep.subr.bf16.mxu0 %v1302_v47 }
  0xaf   : > { %443 = vmatprep.mubr.bf16.mxu1 %v2277_v0 }
  0xb0   : > { %v398_v49 = vpop.permute.xlu0 %397  ;;  %v1295_v51 = vpop.permute.xlu1 %1294 }
  0xb1   : > { %v404_v50 = vsel %vm403_vm7, %v398_v49, %v400_v41  ;;  %v1301_v52 = vsel %vm1300_vm8, %v1295_v51, %v1297_v45  ;;  %v2252_v45 = vld [vmem:[%s2580_s0 + $0xa0] sm:$0xff]   ;;  %vm1783_vm7 = vcmask 433152   ;;  %vm955_vm8 = vcmask 744448  }
  0xb2   : > { %412 = vmatpush1.bf16.msra.mxu1 %v404_v50 }
  0xb3   : > { %2060 = vmatmul.mubr.msk.bf16.vlgmr.msra.gmra.mrb[0].mxu0 %vm212_vm2, %v2242_v48 }
  0xb4   : > { %v469_v53 = vpop.permute.xlu0 %468  ;;  %1309 = vmatpush1.bf16.msra.mxu0 %v1301_v52  ;;  %1340 = vmatprep.mubr.bf16.mxu0 %v2277_v0  ;;  %v471_v54 = vpop.permute.xlu1 %470  ;;  %v2253_v52 = vld [vmem:[%s2580_s0 + $0x40] sm:$0xff]  }
  0xb5   : > { %v474_v56 = vsel %vm472_vm9, %v469_v53, %v471_v54 }
  0xb6   : > { %480 = vmatprep.subr.bf16.mxu1 %v474_v56 }
  0xb8   : > { %v1366_v57 = vpop.permute.xlu0 %1365  ;;  %v1368_v58 = vpop.permute.xlu1 %1367 }
  0xb9   : > { %v1371_v59 = vsel %vm1369_vm10, %v1366_v57, %v1368_v58 }
  0xba   : > { %2012 = vmatmul.mubr.msk.bf16.vlgmr.msra.gmra.mrb[0].mxu1 %vm212_vm2, %v2243_v55  ;;  %1377 = vmatprep.subr.bf16.mxu0 %v1371_v59 }
  0xbb   : > { %512 = vmatprep.mubr.bf16.mxu1 %v2277_v0 }
  0xbc   : > { %v467_v61 = vpop.permute.xlu0 %466  ;;  %v1364_v63 = vpop.permute.xlu1 %1363 }
  0xbd   : > { %v473_v62 = vsel %vm472_vm9, %v467_v61, %v469_v53  ;;  %v1370_v1 = vsel %vm1369_vm10, %v1364_v63, %v1366_v57  ;;  %v2254_v57 = vld [vmem:[%s2580_s0 + $0xa8] sm:$0xff]   ;;  %vm1852_vm9 = vcmask 424960  }
  0xbe   : > { %481 = vmatpush1.bf16.msra.mxu1 %v473_v62 }
  0xbf   : > { %2064 = vmatmul.mubr.msk.bf16.vlgmr.msra.gmra.mrb[0].mxu0 %vm212_vm2, %v2244_v60 }
  0xc0   : > { %v538_v2 = vpop.permute.xlu0 %537  ;;  %1378 = vmatpush1.bf16.msra.mxu0 %v1370_v1  ;;  %1409 = vmatprep.mubr.bf16.mxu0 %v2277_v0  ;;  %v540_v3 = vpop.permute.xlu1 %539  ;;  %v2255_v1 = vld [vmem:[%s2580_s0 + $0x48] sm:$0xff]  }
  0xc1   : > { %v543_v5 = vsel %vm541_vm11, %v538_v2, %v540_v3 }
  0xc2   : > { %549 = vmatprep.subr.bf16.mxu1 %v543_v5 }
  0xc4   : > { %v1435_v6 = vpop.permute.xlu0 %1434  ;;  %v1437_v7 = vpop.permute.xlu1 %1436 }
  0xc5   : > { %v1440_v8 = vsel %vm1438_vm12, %v1435_v6, %v1437_v7 }
  0xc6   : > { %2016 = vmatmul.mubr.msk.bf16.vlgmr.msra.gmra.mrb[0].mxu1 %vm212_vm2, %v2245_v4  ;;  %1446 = vmatprep.subr.bf16.mxu0 %v1440_v8 }
  0xc7   : > { %581 = vmatprep.mubr.bf16.mxu1 %v2277_v0 }
  0xc8   : > { %v536_v10 = vpop.permute.xlu0 %535  ;;  %v1433_v12 = vpop.permute.xlu1 %1432 }
  0xc9   : > { %v542_v11 = vsel %vm541_vm11, %v536_v10, %v538_v2  ;;  %v1439_v13 = vsel %vm1438_vm12, %v1433_v12, %v1435_v6  ;;  %v2256_v6 = vld [vmem:[%s2580_s0 + $0xb0] sm:$0xff]  }
  0xca   : > { %550 = vmatpush1.bf16.msra.mxu1 %v542_v11 }
  0xcb   : > { %2068 = vmatmul.mubr.msk.bf16.vlgmr.msra.gmra.mrb[0].mxu0 %vm212_vm2, %v2246_v9 }
  0xcc   : > { %v607_v14 = vpop.permute.xlu0 %606  ;;  %1447 = vmatpush1.bf16.msra.mxu0 %v1439_v13  ;;  %1478 = vmatprep.mubr.bf16.mxu0 %v2277_v0  ;;  %v609_v15 = vpop.permute.xlu1 %608  ;;  %v2257_v13 = vld [vmem:[%s2580_s0 + $0x50] sm:$0xff]  }
  0xcd   : > { %v612_v17 = vsel %vm610_vm13, %v607_v14, %v609_v15 }
  0xce   : > { %618 = vmatprep.subr.bf16.mxu1 %v612_v17 }
  0xd0   : > { %v1504_v18 = vpop.permute.xlu0 %1503  ;;  %v1506_v19 = vpop.permute.xlu1 %1505 }
  0xd1   : > { %v1509_v20 = vsel %vm1507_vm14, %v1504_v18, %v1506_v19 }
  0xd2   : > { %2020 = vmatmul.mubr.msk.bf16.vlgmr.msra.gmra.mrb[0].mxu1 %vm212_vm2, %v2247_v16  ;;  %1515 = vmatprep.subr.bf16.mxu0 %v1509_v20 }
  0xd3   : > { %650 = vmatprep.mubr.bf16.mxu1 %v2277_v0 }
  0xd4   : > { %v605_v22 = vpop.permute.xlu0 %604  ;;  %v1502_v24 = vpop.permute.xlu1 %1501 }
  0xd5   : > { %v611_v23 = vsel %vm610_vm13, %v605_v22, %v607_v14  ;;  %v1508_v25 = vsel %vm1507_vm14, %v1502_v24, %v1504_v18  ;;  %v2258_v18 = vld [vmem:[%s2580_s0 + $0xb8] sm:$0xff]   ;;  %v2260_v24 = vld [vmem:[%s2580_s0 + $0xc0] sm:$0xff]  }
  0xd6   : > { %619 = vmatpush1.bf16.msra.mxu1 %v611_v23  ;;  %v2259_v23 = vld [vmem:[%s2580_s0 + $0x58] sm:$0xff]  }
  0xd7   : > { %2072 = vmatmul.mubr.msk.bf16.vlgmr.msra.gmra.mrb[0].mxu0 %vm212_vm2, %v2248_v21 }
  0xd8   : > { %v676_v26 = vpop.permute.xlu0 %675  ;;  %1516 = vmatpush1.bf16.msra.mxu0 %v1508_v25  ;;  %1547 = vmatprep.mubr.bf16.mxu0 %v2277_v0  ;;  %v678_v27 = vpop.permute.xlu1 %677 }
  0xd9   : > { %v681_v29 = vsel %vm679_vm15, %v676_v26, %v678_v27 }
  0xda   : > { %687 = vmatprep.subr.bf16.mxu1 %v681_v29 }
  0xdc   : > { %v1573_v30 = vpop.permute.xlu0 %1572  ;;  %v1575_v31 = vpop.permute.xlu1 %1574 }
  0xdd   : > { %v1578_v32 = vsel %vm1576_vm0, %v1573_v30, %v1575_v31 }
  0xde   : > { %2024 = vmatmul.mubr.msk.bf16.vlgmr.msra.gmra.mrb[0].mxu1 %vm212_vm2, %v2249_v28  ;;  %1584 = vmatprep.subr.bf16.mxu0 %v1578_v32 }
  0xdf   : > { %719 = vmatprep.mubr.bf16.mxu1 %v2277_v0 }
  0xe0   : > { %v674_v34 = vpop.permute.xlu0 %673  ;;  %v1571_v36 = vpop.permute.xlu1 %1570 }
  0xe1   : > { %v680_v35 = vsel %vm679_vm15, %v674_v34, %v676_v26  ;;  %v1577_v37 = vsel %vm1576_vm0, %v1571_v36, %v1573_v30 }
  0xe2   : > { %688 = vmatpush1.bf16.msra.mxu1 %v680_v35 }
  0xe3   : > { %2076 = vmatmul.mubr.msk.bf16.vlgmr.msra.gmra.mrb[0].mxu0 %vm212_vm2, %v2250_v33 }
  0xe4   : > { %v745_v38 = vpop.permute.xlu0 %744  ;;  %1585 = vmatpush1.bf16.msra.mxu0 %v1577_v37  ;;  %1616 = vmatprep.mubr.bf16.mxu0 %v2277_v0  ;;  %v747_v39 = vpop.permute.xlu1 %746 }
  0xe5   : > { %v750_v41 = vsel %vm748_vm1, %v745_v38, %v747_v39 }
  0xe6   : > { %756 = vmatprep.subr.bf16.mxu1 %v750_v41 }
  0xe8   : > { %v1642_v42 = vpop.permute.xlu0 %1641  ;;  %v1644_v43 = vpop.permute.xlu1 %1643 }
  0xe9   : > { %v1647_v44 = vsel %vm1645_vm3, %v1642_v42, %v1644_v43 }
  0xea   : > { %2028 = vmatmul.mubr.msk.bf16.vlgmr.msra.gmra.mrb[0].mxu1 %vm212_vm2, %v2251_v40  ;;  %1653 = vmatprep.subr.bf16.mxu0 %v1647_v44 }
  0xeb   : > { %788 = vmatprep.mubr.bf16.mxu1 %v2277_v0 }
  0xec   : > { %v743_v46 = vpop.permute.xlu0 %742  ;;  %v1640_v48 = vpop.permute.xlu1 %1639 }
  0xed   : > { %v749_v47 = vsel %vm748_vm1, %v743_v46, %v745_v38  ;;  %v1646_v49 = vsel %vm1645_vm3, %v1640_v48, %v1642_v42 }
  0xee   : > { %757 = vmatpush1.bf16.msra.mxu1 %v749_v47 }
  0xef   : > { %2080 = vmatmul.mubr.msk.bf16.vlgmr.msra.gmra.mrb[0].mxu0 %vm212_vm2, %v2252_v45 }
  0xf0   : > { %v814_v50 = vpop.permute.xlu0 %813  ;;  %1654 = vmatpush1.bf16.msra.mxu0 %v1646_v49  ;;  %1685 = vmatprep.mubr.bf16.mxu0 %v2277_v0  ;;  %v816_v51 = vpop.permute.xlu1 %815 }
  0xf1   : > { %v819_v53 = vsel %vm817_vm4, %v814_v50, %v816_v51 }
  0xf2   : > { %825 = vmatprep.subr.bf16.mxu1 %v819_v53 }
  0xf4   : > { %v1711_v54 = vpop.permute.xlu0 %1710  ;;  %v1713_v55 = vpop.permute.xlu1 %1712 }
  0xf5   : > { %v1716_v56 = vsel %vm1714_vm5, %v1711_v54, %v1713_v55 }
  0xf6   : > { %2032 = vmatmul.mubr.msk.bf16.vlgmr.msra.gmra.mrb[0].mxu1 %vm212_vm2, %v2253_v52  ;;  %1722 = vmatprep.subr.bf16.mxu0 %v1716_v56 }
  0xf7   : > { %857 = vmatprep.mubr.bf16.mxu1 %v2277_v0 }
  0xf8   : > { %v812_v58 = vpop.permute.xlu0 %811  ;;  %v1709_v60 = vpop.permute.xlu1 %1708 }
  0xf9   : > { %v818_v59 = vsel %vm817_vm4, %v812_v58, %v814_v50  ;;  %v1715_v61 = vsel %vm1714_vm5, %v1709_v60, %v1711_v54 }
  0xfa   : > { %826 = vmatpush1.bf16.msra.mxu1 %v818_v59 }
  0xfb   : > { %2084 = vmatmul.mubr.msk.bf16.vlgmr.msra.gmra.mrb[0].mxu0 %vm212_vm2, %v2254_v57 }
  0xfc   : > { %v883_v62 = vpop.permute.xlu0 %882  ;;  %1723 = vmatpush1.bf16.msra.mxu0 %v1715_v61  ;;  %1754 = vmatprep.mubr.bf16.mxu0 %v2277_v0 }
  0xfd   : > { %v885_v63 = vpop.permute.xlu1 %884 }
  0xfe   : > { %v888_v2 = vsel %vm886_vm6, %v883_v62, %v885_v63 }
  0xff   : > { %894 = vmatprep.subr.bf16.mxu1 %v888_v2 }
 0x100   : > { %v1780_v3 = vpop.permute.xlu0 %1779 }
 0x101   : > { %v1782_v4 = vpop.permute.xlu1 %1781 }
 0x102   : > { %2036 = vmatmul.mubr.msk.bf16.vlgmr.msra.gmra.mrb[0].mxu1 %vm212_vm2, %v2255_v1  ;;  %v1785_v5 = vsel %vm1783_vm7, %v1780_v3, %v1782_v4 }
 0x103   : > { %1791 = vmatprep.subr.bf16.mxu0 %v1785_v5  ;;  %926 = vmatprep.mubr.bf16.mxu1 %v2277_v0 }
 0x104   : > { %v881_v7 = vpop.permute.xlu0 %880 }
 0x105   : > { %v887_v8 = vsel %vm886_vm6, %v881_v7, %v883_v62  ;;  %v1778_v9 = vpop.permute.xlu1 %1777 }
 0x106   : > { %895 = vmatpush1.bf16.msra.mxu1 %v887_v8  ;;  %v1784_v10 = vsel %vm1783_vm7, %v1778_v9, %v1780_v3 }
 0x107   : > { %2088 = vmatmul.mubr.msk.bf16.vlgmr.msra.gmra.mrb[0].mxu0 %vm212_vm2, %v2256_v6 }
 0x108   : > { %v952_v11 = vpop.permute.xlu0 %951  ;;  %1792 = vmatpush1.bf16.msra.mxu0 %v1784_v10  ;;  %1823 = vmatprep.mubr.bf16.mxu0 %v2277_v0 }
 0x109   : > { %v954_v12 = vpop.permute.xlu1 %953 }
 0x10a   : > { %v957_v14 = vsel %vm955_vm8, %v952_v11, %v954_v12 }
 0x10b   : > { %963 = vmatprep.subr.bf16.mxu1 %v957_v14 }
 0x10c   : > { %v1849_v15 = vpop.permute.xlu0 %1848 }
 0x10d   : > { %v1851_v16 = vpop.permute.xlu1 %1850 }
 0x10e   : > { %2040 = vmatmul.mubr.msk.bf16.vlgmr.msra.gmra.mrb[0].mxu1 %vm212_vm2, %v2257_v13  ;;  %v1854_v17 = vsel %vm1852_vm9, %v1849_v15, %v1851_v16 }
 0x10f   : > { %1860 = vmatprep.subr.bf16.mxu0 %v1854_v17  ;;  %995 = vmatprep.mubr.bf16.mxu1 %v2277_v0 }
 0x110   : > { %v950_v19 = vpop.permute.xlu0 %949 }
 0x111   : > { %v956_v20 = vsel %vm955_vm8, %v950_v19, %v952_v11  ;;  %v1847_v21 = vpop.permute.xlu1 %1846 }
 0x112   : > { %964 = vmatpush1.bf16.msra.mxu1 %v956_v20  ;;  %v1853_v22 = vsel %vm1852_vm9, %v1847_v21, %v1849_v15 }
 0x113   : > { %2092 = vmatmul.mubr.msk.bf16.vlgmr.msra.gmra.mrb[0].mxu0 %vm212_vm2, %v2258_v18 }
 0x114   : > { %1861 = vmatpush1.bf16.msra.mxu0 %v1853_v22  ;;  %1892 = vmatprep.mubr.bf16.mxu0 %v2277_v0 }
 0x11a   : > { %2044 = vmatmul.mubr.msk.bf16.vlgmr.msra.gmra.mrb[0].mxu1 %vm212_vm2, %v2259_v23 }
 0x11f   : > { %2096 = vmatmul.mubr.msk.bf16.vlgmr.msra.gmra.mrb[0].mxu0 %vm212_vm2, %v2260_v24 }
 0x121   : > { %v1912_v30 = vpop.permute.xlu0 %1911 }
 0x123   : > { %v1917_v34 = vpop.permute.xlu1 %1916 }
 0x1ed   : > { %v997_v25 = vpop.f32.mrb[0].mxu1 }
 0x1ee   : > { %v999_v26 = vpop.f32.mrb[1].mxu1 }
 0x1ef   : > { %v1001_v27 = vpop.f32.mrb[2].mxu1 }
 0x1f0   : > { %v1003_v28 = vpop.f32.mrb[3].mxu1 }
 0x1f2   : > { %v1894_v29 = vpop.f32.mrb[0].mxu0 }
 0x1f3   : > { %v2100_v31 = vadd.f32 %v1894_v29, %v997_v25  ;;  %v1896_v0 = vpop.f32.mrb[1].mxu0 }
 0x1f4   : > { %v2101_v32 = vadd.f32 %v1896_v0, %v999_v26  ;;  %v1898_v33 = vpop.f32.mrb[2].mxu0 }
 0x1f5   : > { %v1919_v35 = vadd.f32 %v2100_v31, %v1912_v30  ;;  %v2102_v36 = vadd.f32 %v1898_v33, %v1001_v27  ;;  %v1900_v37 = vpop.f32.mrb[3].mxu0 }
 0x1f6   : > { %v1920_v38 = vadd.f32 %v2101_v32, %v1912_v30  ;;  %v2103_v39 = vadd.f32 %v1900_v37, %v1003_v28 }
 0x1f7   : > { %2261 = vtanh.f32 %v1919_v35  ;;  %v1921_v40 = vadd.f32 %v2102_v36, %v1917_v34 }
 0x1f8   : > { %2263 = vtanh.f32 %v1920_v38  ;;  %v1922_v41 = vadd.f32 %v2103_v39, %v1917_v34 }
 0x1f9   : > { %2265 = vtanh.f32 %v1921_v40 }
 0x1fa   : > { %2267 = vtanh.f32 %v1922_v41 }
 0x201   : > { %v2262_v42 = vpop.eup %2261 }
 0x202   : > { %v2264_v43 = vpop.eup %2263  ;;  %1927 = vst [vmem:[%s170_s24] sm:$0xff] %v2262_v42 }
 0x203   : > { %v2266_v44 = vpop.eup %2265  ;;  %1928 = vst [vmem:[%s170_s24 + $0x8] sm:$0xff] %v2264_v43 }
 0x204   : > { %v2268_v45 = vpop.eup %2267  ;;  %1929 = vst [vmem:[%s170_s24 + $0x10] sm:$0xff] %v2266_v44 }
 0x205   : > { %1930 = vst [vmem:[%s170_s24 + $0x18] sm:$0xff] %v2268_v45 }
 0x206 PF: > { %s13_s12 = sadd.s32 1, %s2275_s12  }
 0x207   : > { %p10_p4 = scmp.ge.s32.totalorder %s13_s12, 4  }
 0x209   :  { %12 = sbr.rel (!%p10_p4) target bundleno = 1 (0x1), region = 86 }

</bundles_post_ra>
